<compile_context>
chip_gen: v7x
topology: tpu7x:2x2x1
jax: 0.10.0
libtpu: 0.0.40
codegen_flags: <defaults>
</compile_context>

<pallas_src>
import functools
import math

import jax
import jax.numpy as jnp
from jax.experimental import pallas as pl
from jax.experimental.pallas import tpu as pltpu

MIN_NORM = 1e-15
_LANES = 128


def _scale_from_norm(norm, k):
    """tan_k(norm) / norm with the geoopt MIN_NORM clamp folded in."""
    norm = jnp.maximum(norm, MIN_NORM)
    sk = math.sqrt(abs(k))
    t = jnp.float32(sk) * norm
    if k < 0.0:
        return jnp.tanh(t) / t
    # k > 0: jnp.tan is unbounded near pi/2*(2n+1), exactly as in the geoopt reference.
    return jnp.tan(t) / t


def _expmap0_kernel(x_ref, o_ref, *, k):
    """Generic path: feature dim kept whole on the lane axis."""
    x = x_ref[...]
    xf = x.astype(jnp.float32)
    sq = jnp.sum(xf * xf, axis=-1, keepdims=True)               # (tm, 1) in f32
    scale = _scale_from_norm(jnp.sqrt(sq), k)                    # (tm, 1) narrow divide
    o_ref[...] = (x * scale.astype(x.dtype)).astype(o_ref.dtype)


def _expmap0_packed_kernel(s_ref, st_ref, x_ref, o_ref, *, k):
    """Lane-dense path: each kernel row packs p logical rows of width d.

    s_ref:  (p*d, p) constant 0/1 segment-selection matrix (resident input).
    st_ref: (p, p*d) its transpose (resident input).
    """
    x = x_ref[...]                                               # (tm, p*d)
    xf = x.astype(jnp.float32)
    sq = xf * xf
    # HIGHEST precision keeps the sum-of-squares at f32 accuracy (default bf16
    # MXU pass would exceed the 1e-5 tolerance).  MXU work here is negligible.
    seg_sq = jnp.dot(sq, s_ref[...],
                     precision=jax.lax.Precision.HIGHEST,
                     preferred_element_type=jnp.float32)         # (tm, p)
    scale = _scale_from_norm(jnp.sqrt(seg_sq), k)                # (tm, p) narrow divide
    scale_lanes = jnp.dot(scale, st_ref[...],
                          precision=jax.lax.Precision.HIGHEST,
                          preferred_element_type=jnp.float32)    # (tm, p*d) exact bcast
    o_ref[...] = (x * scale_lanes.astype(x.dtype)).astype(o_ref.dtype)


def _sublane_multiple(dtype):
    """Min second-minor multiple: 8 for 4-byte, 16 for 2-byte, 32 for 1-byte dtypes."""
    return max(8, 32 // jnp.dtype(dtype).itemsize)


def _vmem_budget_bytes():
    """Scoped-VMEM budget for this call: <= half physical VMEM, <= 32 MiB."""
    try:
        cap = int(pltpu.get_tpu_info().vmem_capacity_bytes)
    except Exception:
        cap = 64 << 20   # assume the most constrained generation (v7x per-TC VMEM)
    return min(cap // 2, 32 << 20)


def _max_block_bytes(budget, itemsize):
    """Largest per-block byte size whose full pipeline footprint fits the budget.

    Footprint ~ 4 pipeline buffers (2 in + 2 out) + ~2.5 blocks of f32
    temporaries (upcast squares / broadcasted scale) + 4 MiB margin for the
    resident segment matrices and Mosaic internal scratch.
    """
    denom = 4.0 + 2.5 * (4.0 / float(itemsize))
    return max(256 << 10, min(4 << 20, int((budget - (4 << 20)) / denom)))


def _pick_tile_rows(n_rows, row_bytes, sublane, max_block_bytes):
    """Largest row tile (multiple of `sublane`) within the byte cap, >= 2 grid steps."""
    if n_rows <= sublane:
        return n_rows                       # single block covering the tiny array
    cap = max(sublane, max_block_bytes // max(row_bytes, 1))
    t = min(cap, n_rows)
    t = max(sublane, (t // sublane) * sublane)
    # Ensure at least 2 grid steps so v7x's two TensorCores both stream rows.
    half = (n_rows + 1) // 2
    half = max(sublane, ((half + sublane - 1) // sublane) * sublane)
    return min(t, half)


def expmap0(x: jax.Array, k: float = -1.0, *, tile_rows=None) -> jax.Array:
    """Stereographic exponential map at the origin over the last axis of `x`."""
    k = float(k)
    if k == 0.0 or x.size == 0:
        return x                            # Euclidean limit: expmap0 is the identity

    orig_shape = x.shape
    d = orig_shape[-1]
    x2 = x.reshape(-1, d)
    n = x2.shape[0]
    itemsize = jnp.dtype(x.dtype).itemsize

    # Lane-dense packing: pack p logical rows per kernel row so the lane dim is a
    # multiple of 128 (unmasked full-lane vld/vst) whenever d is not already % 128.
    p = 1
    if d % _LANES != 0:
        pc = _LANES // math.gcd(d, _LANES)
        s_mat_bytes = pc * d * pc * 4
        if pc > 1 and n >= pc and s_mat_bytes <= (256 << 10):
            p = pc

    n_pad = ((n + p - 1) // p) * p
    if n_pad != n:
        x2 = jnp.pad(x2, ((0, n_pad - n), (0, 0)))   # zero rows -> finite scale, sliced off
    n_eff, d_eff = n_pad // p, p * d
    x_eff = x2.reshape(n_eff, d_eff)

    budget = _vmem_budget_bytes()
    sublane = _sublane_multiple(x.dtype)
    if tile_rows is None:
        tile_rows = _pick_tile_rows(n_eff, d_eff * itemsize, sublane,
                                    _max_block_bytes(budget, itemsize))

    grid = (pl.cdiv(n_eff, tile_rows),)
    x_spec = pl.BlockSpec((tile_rows, d_eff), lambda i: (i, 0))
    out_spec = pl.BlockSpec((tile_rows, d_eff), lambda i: (i, 0))
    cost = pl.CostEstimate(
        flops=int(3 * n_eff * d_eff + (4 * n_eff * d_eff * p if p > 1 else 0)),
        transcendentals=int(n_eff * p),
        bytes_accessed=int(2 * n_eff * d_eff * itemsize),
    )
    params = pltpu.CompilerParams(
        dimension_semantics=("parallel",),   # lets v7x shard row blocks across its 2 TCs
        vmem_limit_bytes=budget,             # computed footprint budget, not physical max
    )

    if p > 1:
        # Constant 0/1 segment matrix, built once in the wrapper and kept resident.
        lane = jnp.arange(d_eff, dtype=jnp.int32)[:, None]
        seg = jnp.arange(p, dtype=jnp.int32)[None, :]
        s_mat = ((lane // d) == seg).astype(jnp.float32)          # (d_eff, p)
        s_mat_t = s_mat.T                                         # (p, d_eff)
        out = pl.pallas_call(
            functools.partial(_expmap0_packed_kernel, k=k),
            out_shape=jax.ShapeDtypeStruct((n_eff, d_eff), x.dtype),
            grid=grid,
            in_specs=[
                pl.BlockSpec((d_eff, p), lambda i: (0, 0)),       # resident, DMA'd once
                pl.BlockSpec((p, d_eff), lambda i: (0, 0)),       # resident, DMA'd once
                x_spec,
            ],
            out_specs=out_spec,
            compiler_params=params,
            cost_estimate=cost,
        )(s_mat, s_mat_t, x_eff)
    else:
        out = pl.pallas_call(
            functools.partial(_expmap0_kernel, k=k),
            out_shape=jax.ShapeDtypeStruct((n_eff, d_eff), x.dtype),
            grid=grid,
            in_specs=[x_spec],
            out_specs=out_spec,
            compiler_params=params,
            cost_estimate=cost,
        )(x_eff)

    out = out.reshape(n_pad, d)
    if n_pad != n:
        out = out[:n]
    return out.reshape(orig_shape)


def _expmap0_ref(x: jax.Array, k: float = -1.0) -> jax.Array:
    """Pure-JAX reference mirroring geoopt.Stereographic.expmap0."""
    xf = x.astype(jnp.float32)
    norm = jnp.maximum(jnp.linalg.norm(xf, axis=-1, keepdims=True), MIN_NORM)
    if k < 0.0:
        sk = math.sqrt(-k)
        tan_k = jnp.tanh(sk * norm) / sk
    elif k > 0.0:
        sk = math.sqrt(k)
        tan_k = jnp.tan(sk * norm) / sk
    else:
        tan_k = norm
    return (tan_k * xf / norm).astype(x.dtype)


if __name__ == "__main__":
    key = jax.random.PRNGKey(0)
    cases = [
        # (shape, curvature) — small shapes consistent with the VAE latent layer.
        ((16, 32), -1.0),        # packed path (p=4, d_eff=128), single block
        ((20, 48), -1.0),        # gcd packing (p=8, d_eff=384) + zero-row padding
        ((2, 4, 16, 32), 1.0),   # leading-dim flatten, positive curvature, 2 grid steps
        ((24, 128), -1.0),       # generic lane-dense path, partial last grid block
        ((300, 32), -1.0),       # packed path, multi-step grid with partial last block
    ]
    for i, (shape, k) in enumerate(cases):
        key, sub = jax.random.split(key)
        x = jax.random.normal(sub, shape, dtype=jnp.float32) * 0.2
        out = jax.block_until_ready(expmap0(x, k))
        ref = _expmap0_ref(x, k)
        assert out.shape == x.shape and out.dtype == x.dtype
        assert jnp.allclose(out, ref, atol=1e-5, rtol=1e-5), f"mismatch vs reference (case {i})"
    print("KERNEL_OK")
</pallas_src>

<mosaic_0001>
module attributes {stable_mosaic.version = 11 : i64} {
  func.func @_expmap0_packed_kernel(%arg0: i32, %arg1: memref<128x4xf32, #tpu.memory_space<vmem>>, %arg2: memref<4x128xf32, #tpu.memory_space<vmem>>, %arg3: memref<4x128xf32, #tpu.memory_space<vmem>>, %arg4: memref<4x128xf32, #tpu.memory_space<vmem>>) attributes {dimension_semantics = [#tpu.dimension_semantics<parallel>], iteration_bounds = array<i64: 1>, scalar_prefetch = 0 : i64, scratch_operands = 0 : i64, tpu.core_type = #tpu.core_type<tc>, window_params = [{pipeline_mode = #tpu.pipeline_mode<synchronous>, transform_indices = @transform_0, window_bounds = array<i64: 128, 4>}, {pipeline_mode = #tpu.pipeline_mode<synchronous>, transform_indices = @transform_1, window_bounds = array<i64: 4, 128>}, {transform_indices = @transform_2, window_bounds = array<i64: 4, 128>}, {transform_indices = @transform_3, window_bounds = array<i64: 4, 128>}]} {
    %c0 = arith.constant 0 : index
    %c0_0 = arith.constant 0 : index
    %0 = vector.load %arg3[%c0, %c0_0] : memref<4x128xf32, #tpu.memory_space<vmem>>, vector<4x128xf32>
    %1 = arith.mulf %0, %0 : vector<4x128xf32>
    %c0_1 = arith.constant 0 : index
    %c0_2 = arith.constant 0 : index
    %2 = vector.load %arg1[%c0_1, %c0_2] : memref<128x4xf32, #tpu.memory_space<vmem>>, vector<128x4xf32>
    %cst = arith.constant dense<0.000000e+00> : vector<4x4xf32>
    %3 = tpu.matmul %1, %2, %cst {dimension_numbers = #tpu.dot_dimension_numbers<[1], [0], [0], [1], [0, 0, 1, 1], [], []>, precision = #tpu.contract_precision<fp32>} : vector<4x128xf32>, vector<128x4xf32>, vector<4x4xf32> -> vector<4x4xf32>
    %4 = math.sqrt %3 : vector<4x4xf32>
    %cst_3 = arith.constant 1.000000e-15 : f32
    %5 = vector.broadcast %cst_3 : f32 to vector<4x4xf32>
    %6 = arith.maximumf %4, %5 : vector<4x4xf32>
    %cst_4 = arith.constant 1.000000e+00 : f32
    %7 = vector.broadcast %cst_4 : f32 to vector<4x4xf32>
    %8 = arith.mulf %7, %6 : vector<4x4xf32>
    %9 = math.tanh %8 : vector<4x4xf32>
    %10 = arith.divf %9, %8 : vector<4x4xf32>
    %c0_5 = arith.constant 0 : index
    %c0_6 = arith.constant 0 : index
    %11 = vector.load %arg2[%c0_5, %c0_6] : memref<4x128xf32, #tpu.memory_space<vmem>>, vector<4x128xf32>
    %cst_7 = arith.constant dense<0.000000e+00> : vector<4x128xf32>
    %12 = tpu.matmul %10, %11, %cst_7 {dimension_numbers = #tpu.dot_dimension_numbers<[1], [0], [0], [1], [0, 0, 1, 1], [], []>, precision = #tpu.contract_precision<fp32>} : vector<4x4xf32>, vector<4x128xf32>, vector<4x128xf32> -> vector<4x128xf32>
    %13 = arith.mulf %0, %12 : vector<4x128xf32>
    %c0_8 = arith.constant 0 : index
    %c0_9 = arith.constant 0 : index
    %14 = vector.load %arg4[%c0_8, %c0_9] : memref<4x128xf32, #tpu.memory_space<vmem>>, vector<4x128xf32>
    tpu.vector_store %arg4[%c0_8, %c0_9], %13 {strides = array<i32>} : memref<4x128xf32, #tpu.memory_space<vmem>>, vector<4x128xf32>,
    return
  }
  func.func @transform_0(%arg0: i32) -> (i32, i32) {
    %c0_i32 = arith.constant 0 : i32
    %c0_i32_0 = arith.constant 0 : i32
    %c0_i32_1 = arith.constant 0 : i32
    return %c0_i32, %c0_i32_0 : i32, i32
  }
  func.func @transform_1(%arg0: i32) -> (i32, i32) {
    %c0_i32 = arith.constant 0 : i32
    %c0_i32_0 = arith.constant 0 : i32
    %c0_i32_1 = arith.constant 0 : i32
    return %c0_i32, %c0_i32_0 : i32, i32
  }
  func.func @transform_2(%arg0: i32) -> (i32, i32) {
    %c0_i32 = arith.constant 0 : i32
    %c0_i32_0 = arith.constant 0 : i32
    return %arg0, %c0_i32 : i32, i32
  }
  func.func @transform_3(%arg0: i32) -> (i32, i32) {
    %c0_i32 = arith.constant 0 : i32
    %c0_i32_0 = arith.constant 0 : i32
    return %arg0, %c0_i32 : i32, i32
  }
}

</mosaic_0001>

<bundles_post_ra>
// kernel: tpu_custom_call.1
= control target key start
LH: loop header
LB: loop body
LE: loop exit
PB: predicated region body
PF: predicated region fallthrough
CT: control target
= control target key end

     0   :  { %v1706_v3 = vmov 0.0|0.0   ;;  %vm1707_vm0 = vmmov 0   ;;  %v1708_v11 = vmov 0.0   ;;  %s2082_s0 = inlined_call_operand.vmem [shape: f32[128,4], index: 0, kind: input, shape index: {}]   ;;  %s2083_s1 = inlined_call_operand.vmem [shape: f32[4,128], index: 1, kind: input, shape index: {}]   ;;  %s2084_s2 = inlined_call_operand.vmem [shape: f32[4,128], index: 2, kind: input, shape index: {}]   ;;  %s2085_s3 = inlined_call_operand.hbm [shape: f32[4,128], index: 3, kind: output, shape index: {}]  }
   0x1   :  { %v17_v0 = vld [vmem:[%s2082_s0] sm:$0xff]  ;;  %v18_v1 = vld [vmem:[%s2082_s0 + $0x8] sm:$0xff]  ;;  %v19_v2 = vld [vmem:[%s2082_s0 + $0x10] sm:$0xff]  ;;  %1510 = vmatprep.subr.bf16.mxu1 %v1706_v3  ;;  %1582 = vmatprep.subr.bf16.mxu0 %v1706_v3 }
   0x2   :  { %v34_v4 = vand.u32 4294901760, %v17_v0  ;;  %v37_v5 = vand.u32 4294901760, %v18_v1  ;;  %v20_v6 = vld [vmem:[%s2082_s0 + $0x18] sm:$0xff]  ;;  %v40_v7 = vand.u32 4294901760, %v19_v2  ;;  %v1747_v9 = vld [vmem:[%s2082_s0 + $0x20] sm:$0xff]  ;;  %v1752_v10 = vld [vmem:[%s2082_s0 + $0x28] sm:$0xff]  ;;  %1302 = vmatprep.mubr.msk.f32.mxu1 %vm1707_vm0, %v1708_v11  ;;  %1407 = vmatprep.mubr.msk.f32.mxu0 %vm1707_vm0, %v1708_v11 }
   0x3   :  { %v43_v8 = vand.u32 4294901760, %v20_v6  ;;  %v46_v14 = vand.u32 4294901760, %v1747_v9  ;;  %v49_v15 = vand.u32 4294901760, %v1752_v10  ;;  %v1771_v16 = vld [vmem:[%s2082_s0 + $0x30] sm:$0xff]  ;;  %v1776_v17 = vld [vmem:[%s2082_s0 + $0x38] sm:$0xff] }
   0x4   :  { %v1758_v12 = vpack.c.bf16 %v37_v5, %v34_v4 }
   0x5   :  { %v1762_v13 = vpack.c.bf16 %v43_v8, %v40_v7 }
   0x6   :  { %1512 = vmatpush3.bf16.msra.mxu1 %v1758_v12  ;;  %1584 = vmatpush3.bf16.msra.mxu0 %v1758_v12 }
   0x7   :  { %1513 = vmatprep.subr.bf16.mxu1 %v1706_v3  ;;  %1585 = vmatprep.subr.bf16.mxu0 %v1706_v3 }
   0x8   :  { %8 = vsyncpa [#allocation3], 0  ;;  %v1780_v18 = vpack.c.bf16 %v49_v15, %v46_v14  ;;  %v52_v19 = vand.u32 4294901760, %v1771_v16  ;;  %v55_v20 = vand.u32 4294901760, %v1776_v17  ;;  %v1787_v21 = vld [vmem:[%s2084_s2] sm:$0xf]  ;;  %v1821_v30 = vsub.f32 %v17_v0, %v34_v4 }
   0x9   :  { %v1794_v22 = vld [vmem:[%s2082_s0 + $0x40] sm:$0xff]  ;;  %v1799_v23 = vld [vmem:[%s2082_s0 + $0x48] sm:$0xff]  ;;  %v16_v24 = vmul.f32 %v1787_v21, %v1787_v21  ;;  %v1814_v28 = vld [vmem:[%s2082_s0 + $0x50] sm:$0xff]  ;;  %v1825_v32 = vsub.f32 %v18_v1, %v37_v5  ;;  %v1845_v38 = vsub.f32 %v19_v2, %v40_v7  ;;  %v1847_v39 = vsub.f32 %v20_v6, %v43_v8 }
   0xa   :  { %1515 = vmatpush3.bf16.msra.mxu1 %v1762_v13  ;;  %1587 = vmatpush3.bf16.msra.mxu0 %v1762_v13  ;;  %v1805_v25 = vpack.c.bf16 %v55_v20, %v52_v19  ;;  %v58_v26 = vand.u32 4294901760, %v1794_v22  ;;  %v61_v27 = vand.u32 4294901760, %v1799_v23  ;;  %v1819_v29 = vld [vmem:[%s2082_s0 + $0x58] sm:$0xff]  ;;  %v64_v34 = vand.u32 4294901760, %v1814_v28  ;;  %v1836_v36 = vld [vmem:[%s2082_s0 + $0x60] sm:$0xff]  ;;  %v1843_v37 = vld [vmem:[%s2082_s0 + $0x68] sm:$0xff] }
   0xb   :  { %1516 = vmatprep.subr.bf16.mxu1 %v1706_v3  ;;  %1588 = vmatprep.subr.bf16.mxu0 %v1706_v3  ;;  %v1823_v31 = vand.u32 4294901760, %v16_v24  ;;  %v67_v35 = vand.u32 4294901760, %v1819_v29  ;;  %v70_v40 = vand.u32 4294901760, %v1836_v36  ;;  %v73_v43 = vand.u32 4294901760, %v1843_v37  ;;  %v1865_v44 = vld [vmem:[%s2082_s0 + $0x70] sm:$0xff]  ;;  %v1870_v45 = vld [vmem:[%s2082_s0 + $0x78] sm:$0xff] }
   0xc   :  { %v1829_v33 = vpack.c.bf16 %v61_v27, %v58_v26  ;;  %v127_v46 = vand.u32 4294901760, %v1821_v30  ;;  %v134_v47 = vand.u32 4294901760, %v1825_v32  ;;  %v1877_v48 = vsub.f32 %v1747_v9, %v46_v14 }
   0xd   :  { %v1851_v41 = vsub.f32 %v16_v24, %v1823_v31  ;;  %v1859_v42 = vpack.c.bf16 %v67_v35, %v64_v34  ;;  %v1880_v49 = vsub.f32 %v1752_v10, %v49_v15  ;;  %v76_v50 = vand.u32 4294901760, %v1865_v44 }
   0xe   :  { %1518 = vmatpush3.bf16.msra.mxu1 %v1780_v18  ;;  %1590 = vmatpush3.bf16.msra.mxu0 %v1780_v18  ;;  %v79_v51 = vand.u32 4294901760, %v1870_v45  ;;  %v141_v53 = vand.u32 4294901760, %v1845_v38  ;;  %v1892_v54 = vpack.c.bf16 %v73_v43, %v70_v40  ;;  %v128_v55 = vsub.f32 %v1821_v30, %v127_v46 }
   0xf   :  { %1519 = vmatprep.subr.bf16.mxu1 %v1706_v3  ;;  %1591 = vmatprep.subr.bf16.mxu0 %v1706_v3  ;;  %v116_v52 = vand.u32 4294901760, %v1851_v41  ;;  %v135_v56 = vsub.f32 %v1825_v32, %v134_v47  ;;  %v148_v57 = vand.u32 4294901760, %v1847_v39  ;;  %v1900_v58 = vsub.f32 %v1771_v16, %v52_v19 }
  0x10   :  { %v1903_v59 = vsub.f32 %v1776_v17, %v55_v20  ;;  %v142_v61 = vsub.f32 %v1845_v38, %v141_v53  ;;  %v155_v62 = vand.u32 4294901760, %v1877_v48  ;;  %v162_v63 = vand.u32 4294901760, %v1880_v49 }
  0x11   :  { %v117_v60 = vsub.f32 %v1851_v41, %v116_v52  ;;  %v1915_v0 = vpack.c.bf16 %v79_v51, %v76_v50  ;;  %v129_v1 = vand.u32 4294901760, %v128_v55  ;;  %v136_v2 = vand.u32 4294901760, %v135_v56 }
  0x12   :  { %1521 = vmatpush3.bf16.msra.mxu1 %v1805_v25  ;;  %1593 = vmatpush3.bf16.msra.mxu0 %v1805_v25  ;;  %v149_v4 = vsub.f32 %v1847_v39, %v148_v57  ;;  %v1921_v5 = vsub.f32 %v1794_v22, %v58_v26  ;;  %v1924_v6 = vsub.f32 %v1799_v23, %v61_v27  ;;  %v143_v9 = vand.u32 4294901760, %v142_v61 }
  0x13   :  { %1522 = vmatprep.subr.bf16.mxu1 %v1706_v3  ;;  %1594 = vmatprep.subr.bf16.mxu0 %v1706_v3  ;;  %v1607_v7 = vpack.c.bf16 %v134_v47, %v127_v46  ;;  %v118_v8 = vand.u32 4294901760, %v117_v60  ;;  %v156_v10 = vsub.f32 %v1877_v48, %v155_v62  ;;  %v163_v14 = vsub.f32 %v1880_v49, %v162_v63 }
  0x14   :  { %v1535_v15 = vpack.c.bf16 %v136_v2, %v129_v1  ;;  %v150_v16 = vand.u32 4294901760, %v149_v4  ;;  %v169_v17 = vand.u32 4294901760, %v1900_v58  ;;  %v176_v19 = vand.u32 4294901760, %v1903_v59 }
  0x15   :  { %v1937_v20 = vsub.f32 %v1814_v28, %v64_v34  ;;  %v1942_v22 = vsub.f32 %v1819_v29, %v67_v35  ;;  %v1610_v23 = vpack.c.bf16 %v148_v57, %v141_v53  ;;  %v157_v24 = vand.u32 4294901760, %v156_v10 }
  0x16   :  { %1524 = vmatpush3.bf16.msra.mxu1 %v1829_v33  ;;  %1596 = vmatpush3.bf16.msra.mxu0 %v1829_v33  ;;  %v164_v26 = vand.u32 4294901760, %v163_v14  ;;  %v183_v27 = vand.u32 4294901760, %v1921_v5  ;;  %v1538_v46 = vpack.c.bf16 %v150_v16, %v143_v9  ;;  %v170_v47 = vsub.f32 %v1900_v58, %v169_v17 }
  0x17   :  { %1525 = vmatprep.subr.bf16.mxu1 %v1706_v3  ;;  %1597 = vmatprep.subr.bf16.mxu0 %v1706_v3  ;;  %v177_v28 = vsub.f32 %v1903_v59, %v176_v19  ;;  %v190_v34 = vand.u32 4294901760, %v1924_v6  ;;  %v1953_v29 = vsub.f32 %v1836_v36, %v70_v40  ;;  %v1958_v35 = vsub.f32 %v1843_v37, %v73_v43 }
  0x18   :  { %v1613_v53 = vpack.c.bf16 %v162_v63, %v155_v62  ;;  %v184_v55 = vsub.f32 %v1921_v5, %v183_v27  ;;  %v197_v56 = vand.u32 4294901760, %v1937_v20  ;;  %v171_v36 = vand.u32 4294901760, %v170_v47 }
  0x19   :  { %v178_v40 = vand.u32 4294901760, %v177_v28  ;;  %v191_v57 = vsub.f32 %v1924_v6, %v190_v34  ;;  %v204_v37 = vand.u32 4294901760, %v1942_v22  ;;  %v1973_v43 = vsub.f32 %v1865_v44, %v76_v50 }
  0x1a   :  { %1527 = vmatpush3.bf16.msra.mxu1 %v1859_v42  ;;  %1599 = vmatpush3.bf16.msra.mxu0 %v1859_v42  ;;  %v1978_v60 = vsub.f32 %v1870_v45, %v79_v51  ;;  %v1616_v61 = vpack.c.bf16 %v176_v19, %v169_v17  ;;  %v185_v62 = vand.u32 4294901760, %v184_v55  ;;  %v198_v63 = vsub.f32 %v1937_v20, %v197_v56 }
  0x1b   :  { %1528 = vmatprep.subr.bf16.mxu1 %v1706_v3  ;;  %1600 = vmatprep.subr.bf16.mxu0 %v1706_v3  ;;  %v211_v1 = vand.u32 4294901760, %v1953_v29  ;;  %v1544_v2 = vpack.c.bf16 %v178_v40, %v171_v36  ;;  %v192_v4 = vand.u32 4294901760, %v191_v57  ;;  %v218_v44 = vand.u32 4294901760, %v1958_v35 }
  0x1c   :  { %v1619_v45 = vpack.c.bf16 %v190_v34, %v183_v27  ;;  %v199_v50 = vand.u32 4294901760, %v198_v63  ;;  %v1622_v16 = vpack.c.bf16 %v204_v37, %v197_v56  ;;  %v1562_v55 = vpack.c.bf16 %v1847_v39, %v1845_v38 }
  0x1d   :  { %v212_v51 = vsub.f32 %v1953_v29, %v211_v1  ;;  %v1547_v9 = vpack.c.bf16 %v192_v4, %v185_v62  ;;  %v219_v14 = vsub.f32 %v1958_v35, %v218_v44  ;;  %vm690_vm1 = vcmask 1043456  }
  0x1e   :  { %1530 = vmatpush3.bf16.msra.mxu1 %v1892_v54  ;;  %1602 = vmatpush3.bf16.msra.mxu0 %v1892_v54  ;;  %vm686_vm4 = vcmask 31744  }
  0x1f   :  { %1531 = vmatprep.subr.bf16.mxu1 %v1706_v3  ;;  %1603 = vmatprep.subr.bf16.mxu0 %v1706_v3  ;;  %v213_v17 = vand.u32 4294901760, %v212_v51 }
  0x22   :  { %1533 = vmatpush3.bf16.msra.mxu1 %v1915_v0  ;;  %1605 = vmatpush3.bf16.msra.mxu0 %v1915_v0 }
  0x23   :  { %1534 = vmatprep.subr.bf16.mxu1 %v1706_v3  ;;  %1606 = vmatprep.subr.bf16.mxu0 %v1706_v3 }
  0x25   :  { %1303 = vmatmul.mubr.f32.vlgmr.msra.gmra.mrb[0].mxu1 %v118_v8  ;;  %1408 = vmatmul.mubr.f32.vlgmr.msra.gmra.mrb[0].mxu0 %v116_v52  ;;  %v1541_v52 = vpack.c.bf16 %v164_v26, %v157_v24  ;;  %v225_v8 = vand.u32 4294901760, %v1973_v43 }
  0x26   :  { %1536 = vmatpush3.bf16.msra.mxu1 %v1535_v15  ;;  %1608 = vmatpush3.bf16.msra.mxu0 %v1607_v7  ;;  %v205_v7 = vsub.f32 %v1942_v22, %v204_v37  ;;  %v232_v15 = vand.u32 4294901760, %v1978_v60 }
  0x27   :  { %1537 = vmatprep.subr.bf16.mxu1 %v1706_v3  ;;  %1609 = vmatprep.subr.bf16.mxu0 %v1706_v3  ;;  %v226_v24 = vsub.f32 %v1973_v43, %v225_v8 }
  0x28   :  { %1337 = vmatprep.mubr.msk.f32.mxu1 %vm1707_vm0, %v1708_v11  ;;  %1442 = vmatprep.mubr.msk.f32.mxu0 %vm1707_vm0, %v1708_v11  ;;  %v206_v10 = vand.u32 4294901760, %v205_v7  ;;  %v233_v26 = vsub.f32 %v1978_v60, %v232_v15 }
  0x29   :  { %v227_v47 = vand.u32 4294901760, %v226_v24 }
  0x2a   :  { %1539 = vmatpush3.bf16.msra.mxu1 %v1538_v46  ;;  %1611 = vmatpush3.bf16.msra.mxu0 %v1610_v23  ;;  %v1550_v19 = vpack.c.bf16 %v206_v10, %v199_v50  ;;  %v220_v23 = vand.u32 4294901760, %v219_v14  ;;  %v1625_v46 = vpack.c.bf16 %v218_v44, %v211_v1  ;;  %v234_v28 = vand.u32 4294901760, %v233_v26 }
  0x2b   :  { %1540 = vmatprep.subr.bf16.mxu1 %v1706_v3  ;;  %1612 = vmatprep.subr.bf16.mxu0 %v1706_v3 }
  0x2c   :  { %v1553_v27 = vpack.c.bf16 %v220_v23, %v213_v17  ;;  %v1556_v34 = vpack.c.bf16 %v234_v28, %v227_v47 }
  0x2e   :  { %1542 = vmatpush3.bf16.msra.mxu1 %v1541_v52  ;;  %1614 = vmatpush3.bf16.msra.mxu0 %v1613_v53  ;;  %v1628_v52 = vpack.c.bf16 %v232_v15, %v225_v8  ;;  %v1559_v53 = vpack.c.bf16 %v1825_v32, %v1821_v30  ;;  %v1565_v30 = vpack.c.bf16 %v1880_v49, %v1877_v48 }
  0x2f   :  { %1543 = vmatprep.subr.bf16.mxu1 %v1706_v3  ;;  %1615 = vmatprep.subr.bf16.mxu0 %v1706_v3  ;;  %v1580_v32 = vpack.c.bf16 %v1978_v60, %v1973_v43 }
  0x32   :  { %1545 = vmatpush3.bf16.msra.mxu1 %v1544_v2  ;;  %1617 = vmatpush3.bf16.msra.mxu0 %v1616_v61 }
  0x33   :  { %1546 = vmatprep.subr.bf16.mxu1 %v1706_v3  ;;  %1618 = vmatprep.subr.bf16.mxu0 %v1706_v3 }
  0x36   :  { %1548 = vmatpush3.bf16.msra.mxu1 %v1547_v9  ;;  %1620 = vmatpush3.bf16.msra.mxu0 %v1619_v45 }
  0x37   :  { %1549 = vmatprep.subr.bf16.mxu1 %v1706_v3  ;;  %1621 = vmatprep.subr.bf16.mxu0 %v1706_v3 }
  0x3a   :  { %1551 = vmatpush3.bf16.msra.mxu1 %v1550_v19  ;;  %1623 = vmatpush3.bf16.msra.mxu0 %v1622_v16 }
  0x3b   :  { %1552 = vmatprep.subr.bf16.mxu1 %v1706_v3  ;;  %1624 = vmatprep.subr.bf16.mxu0 %v1706_v3 }
  0x3e   :  { %1554 = vmatpush3.bf16.msra.mxu1 %v1553_v27  ;;  %1626 = vmatpush3.bf16.msra.mxu0 %v1625_v46 }
  0x3f   :  { %1555 = vmatprep.subr.bf16.mxu1 %v1706_v3  ;;  %1627 = vmatprep.subr.bf16.mxu0 %v1706_v3 }
  0x42   :  { %1557 = vmatpush3.bf16.msra.mxu1 %v1556_v34  ;;  %1629 = vmatpush3.bf16.msra.mxu0 %v1628_v52 }
  0x43   :  { %1558 = vmatprep.subr.bf16.mxu1 %v1706_v3  ;;  %1630 = vmatprep.subr.bf16.mxu0 %v1706_v3 }
  0x45   :  { %1338 = vmatmul.mubr.f32.vlgmr.msra.gmra.mrb[0].mxu1 %v1823_v31  ;;  %1443 = vmatmul.mubr.f32.vlgmr.msra.gmra.mrb[0].mxu0 %v1823_v31 }
  0x46   :  { %1560 = vmatpush3.bf16.msra.mxu1 %v1559_v53  ;;  %1632 = vmatpush3.bf16.msra.mxu0 %v1758_v12  ;;  %v1568_v12 = vpack.c.bf16 %v1903_v59, %v1900_v58 }
  0x47   :  { %1561 = vmatprep.subr.bf16.mxu1 %v1706_v3  ;;  %1633 = vmatprep.subr.bf16.mxu0 %v1706_v3 }
  0x48   :  { %1372 = vmatprep.mubr.msk.f32.mxu1 %vm1707_vm0, %v1708_v11  ;;  %1477 = vmatprep.mubr.msk.f32.mxu0 %vm1707_vm0, %v1708_v11 }
  0x4a   :  { %1563 = vmatpush3.bf16.msra.mxu1 %v1562_v55  ;;  %1635 = vmatpush3.bf16.msra.mxu0 %v1762_v13  ;;  %v1571_v13 = vpack.c.bf16 %v1924_v6, %v1921_v5 }
  0x4b   :  { %1564 = vmatprep.subr.bf16.mxu1 %v1706_v3  ;;  %1636 = vmatprep.subr.bf16.mxu0 %v1706_v3 }
  0x4e   :  { %1566 = vmatpush3.bf16.msra.mxu1 %v1565_v30  ;;  %1638 = vmatpush3.bf16.msra.mxu0 %v1780_v18  ;;  %v1574_v18 = vpack.c.bf16 %v1942_v22, %v1937_v20 }
  0x4f   :  { %1567 = vmatprep.subr.bf16.mxu1 %v1706_v3  ;;  %1639 = vmatprep.subr.bf16.mxu0 %v1706_v3 }
  0x52   :  { %1569 = vmatpush3.bf16.msra.mxu1 %v1568_v12  ;;  %1641 = vmatpush3.bf16.msra.mxu0 %v1805_v25  ;;  %v1577_v25 = vpack.c.bf16 %v1958_v35, %v1953_v29 }
  0x53   :  { %1570 = vmatprep.subr.bf16.mxu1 %v1706_v3  ;;  %1642 = vmatprep.subr.bf16.mxu0 %v1706_v3 }
  0x56   :  { %1572 = vmatpush3.bf16.msra.mxu1 %v1571_v13  ;;  %1644 = vmatpush3.bf16.msra.mxu0 %v1829_v33 }
  0x57   :  { %1573 = vmatprep.subr.bf16.mxu1 %v1706_v3  ;;  %1645 = vmatprep.subr.bf16.mxu0 %v1706_v3 }
  0x5a   :  { %1575 = vmatpush3.bf16.msra.mxu1 %v1574_v18  ;;  %1647 = vmatpush3.bf16.msra.mxu0 %v1859_v42 }
  0x5b   :  { %1576 = vmatprep.subr.bf16.mxu1 %v1706_v3  ;;  %1648 = vmatprep.subr.bf16.mxu0 %v1706_v3 }
  0x5e   :  { %1578 = vmatpush3.bf16.msra.mxu1 %v1577_v25  ;;  %1650 = vmatpush3.bf16.msra.mxu0 %v1892_v54 }
  0x5f   :  { %1579 = vmatprep.subr.bf16.mxu1 %v1706_v3  ;;  %1651 = vmatprep.subr.bf16.mxu0 %v1706_v3  ;;  %v685_v3 = vld [vmem:[%s2083_s1] sm:$0xf]  ;;  %s1709_s1 = smov [#allocation2]  }
  0x60   :  { %v692_v33 = vsel %vm690_vm1, %v685_v3, 0  ;;  %s1148_s19 = sshll.u32 %s1709_s1, 4  ;;  %s1149_s19 = int_to_ptr.vmem [resolvable:$true] %s1148_s19 }
  0x61   :  { %v695_v38 = vand.u32 4294901760, %v692_v33  ;;  %s1682_s20 = scalar_lea.vmem %s1149_s19, 64  ;;  %p1687_p1 = scmp.lt.s32.totalorder %s1149_s19, %s1149_s19 }
  0x62   :  { %1581 = vmatpush3.bf16.msra.mxu1 %v1580_v32  ;;  %1653 = vmatpush3.bf16.msra.mxu0 %v1915_v0  ;;  %p1683_p0 = scmp.ne.s32.totalorder %s1149_s19, %s1682_s20  ;;  %p1688_p2 = scmp.lt.s32.totalorder %s1682_s20, %s1682_s20 }
  0x63   :  { %1495 = vmatprep.subr.mxu1 %v1708_v11  ;;  %1480 = vmatprep.subr.mxu0 %v1708_v11  ;;  %v772_v20 = vsub.f32 %v692_v33, %v695_v38 }
  0x64   :  { %p1689_p3 = por %p1688_p2, %p1687_p1 }
  0x65   :  { %1373 = vmatmul.mubr.f32.vlgmr.msra.gmra.mrb[0].mxu1 %v1851_v41  ;;  %1478 = vmatmul.mubr.f32.vlgmr.msra.gmra.mrb[0].mxu0 %v1823_v31  ;;  %v773_v56 = vand.u32 4294901760, %v772_v20 }
  0x66   :  { %1497 = vmatprep.mubr.msk.f32.mxu1 %vm1707_vm0, %v1708_v11  ;;  %1482 = vmatprep.mubr.msk.f32.mxu0 %vm1707_vm0, %v1708_v11  ;;  %p1690_p4 = pnand %p1689_p3, %p1683_p0 }
  0x67   :  { %1496 = vmatpush3.msra.mxu1 %v695_v38  ;;  %1481 = vmatpush3.msra.mxu0 %v695_v38  ;;  %v774_v57 = vsub.f32 %v772_v20, %v773_v56 }
  0x68   :  { %1485 = vmatprep.subr.mxu0 %v1708_v11  ;;  %1500 = vmatprep.subr.mxu1 %v1708_v11 }
  0x69   :  { %v775_v60 = vand.u32 4294901760, %v774_v57 }
 0x138   :  { %v375_v31 = vpop.f32.mrb[0].mxu1  ;;  %v670_v39 = vpop.f32.mrb[0].mxu0 }
 0x139   :  { %v1654_v41 = vadd.f32 %v670_v39, %v375_v31  ;;  %v1374_v42 = vpop.f32.mrb[1].mxu1  ;;  %v1479_v48 = vpop.f32.mrb[1].mxu0 }
 0x13b   :  { %1676 = vrsqrt.f32 %v1654_v41  ;;  %vm676_vm2 = vcmp.eq.f32.partialorder %v1654_v41, inf  ;;  %v679_v58 = vand.u32 2147483648, %v1654_v41  ;;  %vm678_vm3 = vcmp.eq.f32.partialorder %v1654_v41, 0.0 }
 0x145   :  { %v1677_v49 = vpop.eup %1676 }
 0x146   :  { %v675_v54 = vmul.f32 %v1677_v49, %v1654_v41 }
 0x148   :  { %v677_v59 = vsel %vm676_vm2, %v1654_v41, %v675_v54 }
 0x149   :  { %v680_v0 = vsel %vm678_vm3, %v679_v58, %v677_v59 }
 0x14a   :  { %v681_v5 = vmax.f32 %v680_v0, 1e-15 }
 0x14c   :  { %1678 = vtanh.f32 %v681_v5 }
 0x14d   :  { %1680 = vrcp.f32 %v681_v5 }
 0x156   :  { %v1679_v6 = vpop.eup %1678 }
 0x157   :  { %v1681_v22 = vpop.eup %1680 }
 0x158   :  { %v684_v29 = vmul.f32 %v1681_v22, %v1679_v6 }
 0x15a   :  { %v688_v35 = vsel %vm686_vm4, %v684_v29, 0 }
 0x15b   :  { %v760_v36 = vand.u32 4294901760, %v688_v35 }
 0x15d   :  { %v761_v40 = vsub.f32 %v688_v35, %v760_v36 }
 0x15f   :  { %v762_v37 = vand.u32 4294901760, %v761_v40 }
 0x161   :  { %1498 = vmatmul.mubr.f32.vlgmr.msra.gmra.mrb[2].mxu1 %v762_v37  ;;  %v763_v43 = vsub.f32 %v761_v40, %v762_v37 }
 0x162   :  { %1501 = vmatpush3.msra.mxu1 %v773_v56  ;;  %1502 = vmatprep.mubr.msk.f32.mxu1 %vm1707_vm0, %v1708_v11 }
 0x163   :  { %v764_v61 = vand.u32 4294901760, %v763_v43  ;;  %1505 = vmatprep.subr.mxu1 %v1708_v11 }
 0x165   :  { %1483 = vmatmul.mubr.f32.vlgmr.msra.gmra.mrb[2].mxu0 %v764_v61 }
 0x166   :  { %1486 = vmatpush3.msra.mxu0 %v775_v60  ;;  %1487 = vmatprep.mubr.msk.f32.mxu0 %vm1707_vm0, %v1708_v11 }
 0x167   :  { %1490 = vmatprep.subr.mxu0 %v1708_v11 }
 0x169   :  { %1503 = vmatmul.mubr.f32.vlgmr.msra.gmra.mrb[2].mxu1 %v760_v36 }
 0x16a   :  { %1506 = vmatpush3.msra.mxu1 %v695_v38  ;;  %1507 = vmatprep.mubr.msk.f32.mxu1 %vm1707_vm0, %v1708_v11 }
 0x16d   :  { %1488 = vmatmul.mubr.f32.vlgmr.msra.gmra.mrb[2].mxu0 %v760_v36 }
 0x16e   :  { %1491 = vmatpush3.msra.mxu0 %v772_v20  ;;  %1492 = vmatprep.mubr.msk.f32.mxu0 %vm1707_vm0, %v1708_v11 }
 0x171   :  { %1508 = vmatmul.mubr.f32.vlgmr.msra.gmra.mrb[2].mxu1 %v760_v36 }
 0x175   :  { %1493 = vmatmul.mubr.f32.vlgmr.msra.gmra.mrb[2].mxu0 %v761_v40 }
 0x244   :  { %v1136_v62 = vpop.f32.mrb[2].mxu1 }
 0x245   :  { %v1509_v63 = vpop.f32.mrb[3].mxu1 }
 0x248   :  { %v916_v1 = vpop.f32.mrb[2].mxu0 }
 0x249   :  { %v1655_v2 = vadd.f32 %v1136_v62, %v916_v1  ;;  %v1494_v4 = vpop.f32.mrb[3].mxu0 }
 0x24b   :  { %v1140_v7 = vmul.f32 %v1655_v2, %v1787_v21 }
 0x24d   :  { %1141 = vst [vmem:[#allocation2] sm:$0xf] %v1140_v7 }
 0x24e   :  { %1693 = shalt.err (!%p1690_p4)
}
 0x24f   :  { %s1694_s23 = scalar_lea.hbm %s2085_s3, 64 }
 0x250   :  { %p1695_p5 = scmp.ne.s32.totalorder %s2085_s3, %s1694_s23  ;;  %p1698_p6 = scmp.lt.u32.totalorder %s1694_s23, %s2085_s3 }
 0x252   :  { %p1700_p7 = pnand %p1698_p6, %p1695_p5 }
 0x254   :  { %1703 = shalt.err (!%p1700_p7)
}
 0x255   :  { %1151 = dma.vmem_to_hbm [thread:$0]  %s1149_s19, 64, %s2085_s3, [#allocation3]  }
 0x256   :  { %1704 = dma.done.wait [#allocation3], 64  }
 0x257   :  { %1705 = vsyncadd [#allocation3], 4294967232 }
 0x258   :  { %1155 = vsyncpa [#allocation3], 1 }

</bundles_post_ra>
